<compile_context>
chip_gen: v6e
topology: v6e:2x2x1
jax: 0.10.0
libtpu: 0.0.40
codegen_flags: <defaults>
</compile_context>

<pallas_src>
import numpy as np
import jax
import jax.numpy as jnp
from jax import lax
from jax.experimental import pallas as pl
from jax.experimental.pallas import tpu as pltpu


# ----------------------------------------------------------------------------
# e3nn normalize2mom constant for SiLU, computed by deterministic quadrature.
# (e3nn itself uses a fixed Monte-Carlo estimate; values agree to ~1e-3.)
# ----------------------------------------------------------------------------
def _normalize2mom_const(act_np):
    z = np.linspace(-8.0, 8.0, 200_001)
    pdf = np.exp(-0.5 * z * z) / np.sqrt(2.0 * np.pi)
    y = act_np(z) ** 2 * pdf
    m2 = float(np.sum(0.5 * (y[1:] + y[:-1]) * np.diff(z)))  # trapezoid rule
    return float(1.0 / np.sqrt(m2))


def _silu_np(x):
    return x / (1.0 + np.exp(-x))


ACT_CST = _normalize2mom_const(_silu_np)  # normalize2mom scale for SiLU


def _round_up(v, m):
    return ((v + m - 1) // m) * m


def _silu(h):
    # SiLU = h * sigmoid(h), with sigmoid(h) = 0.5*(tanh(h/2) + 1):
    # a single EUP transcendental per element instead of exp + divide.
    return h * (0.5 * (jnp.tanh(0.5 * h) + 1.0))


# ----------------------------------------------------------------------------
# Pallas kernel: the whole FullyConnectedNet hot path, lane-dense internally
# (nodes on the 128-lane axis).  All scalar constants are pre-folded into the
# weights, so the body is pure matmul -> SiLU -> matmul -> SiLU -> matmul.
# ----------------------------------------------------------------------------
def _fcn_kernel(x_ref, w0t_ref, w1t_ref, w2t_ref, ot_ref):
    # x_ref  : (tile_n, d_in)     native node-major layout (no XLA transpose)
    # w*t_ref: (fan_out, fan_in)  pre-scaled, pre-transposed weights
    # ot_ref : (d_out, tile_n)    lane-dense output (nodes on the lane axis)
    mxu_dtype = w0t_ref.dtype

    # layer 0: W0' @ x^T expressed as a trailing-axis contraction so the MXU
    # consumes the native (tile_n, d_in) x tile without a materialized
    # transpose (same form as q @ k^T in flash attention).
    h = lax.dot_general(
        w0t_ref[...], x_ref[...],
        dimension_numbers=(((1,), (1,)), ((), ())),
        preferred_element_type=jnp.float32)                     # (h0, tile_n)
    h = _silu(h)

    # layer 1 (normalize2mom const of layer 0 is folded into w1t)
    h = jnp.dot(w1t_ref[...], h.astype(mxu_dtype),
                preferred_element_type=jnp.float32)              # (h1, tile_n)
    h = _silu(h)

    # layer 2 (output, no activation; const of layer 1 folded into w2t)
    y = jnp.dot(w2t_ref[...], h.astype(mxu_dtype),
                preferred_element_type=jnp.float32)              # (d_out, tile_n)

    ot_ref[...] = y.astype(ot_ref.dtype)


# ----------------------------------------------------------------------------
# Wrapper around pallas_call (expects already pre-scaled, transposed weights).
# ----------------------------------------------------------------------------
def _fcn_forward(x, w0t, w1t, w2t, *, tile_n=512, lane_dense_output=False):
    n, d_in = x.shape
    h0 = w0t.shape[0]
    h1 = w1t.shape[0]
    d_out = w2t.shape[0]
    out_dtype = x.dtype
    mxu_dtype = w0t.dtype

    # ---- node tiling: multiple of 128 on the lane axis ---------------------
    tile = max(128, _round_up(int(tile_n), 128))
    n_pad = _round_up(max(n, 1), 128)
    tile = min(tile, n_pad)
    if n_pad >= 512:
        # >= 4 grid steps: each of v7x's two TensorCores gets >= 2 pipelined
        # steps so input-tile DMAs double-buffer (neutral on 1-TC v5e/v6e).
        tile = min(tile, _round_up(pl.cdiv(n_pad, 4), 128))
    elif n_pad >= 256:
        tile = min(tile, _round_up(pl.cdiv(n_pad, 2), 128))
    n_pad = _round_up(n_pad, tile)
    grid = n_pad // tile

    xp = x.astype(mxu_dtype)
    if n_pad != n:
        # pad once, in the native layout (only the tail tile is padded;
        # SiLU(0) = 0 so padded rows produce zeros and are sliced off below).
        xp = jnp.pad(xp, ((0, n_pad - n), (0, 0)))

    el = np.dtype(mxu_dtype).itemsize
    cost = pl.CostEstimate(
        flops=2 * n_pad * (d_in * h0 + h0 * h1 + h1 * d_out),
        transcendentals=n_pad * (h0 + h1),
        bytes_accessed=(n_pad * d_in * el
                        + n_pad * d_out * np.dtype(out_dtype).itemsize
                        + (d_in * h0 + h0 * h1 + h1 * d_out) * el),
    )

    yt = pl.pallas_call(
        _fcn_kernel,
        out_shape=jax.ShapeDtypeStruct((d_out, n_pad), out_dtype),
        grid_spec=pltpu.PrefetchScalarGridSpec(
            num_scalar_prefetch=0,
            grid=(grid,),
            in_specs=[
                pl.BlockSpec((tile, d_in), lambda i: (i, 0)),   # x tile, native
                # Weights are tiny (<10 KiB total) and constant across the
                # grid; the pipeline skips re-fetching blocks whose index does
                # not change, so no pipeline_mode override is needed.
                pl.BlockSpec((h0, d_in), lambda i: (0, 0)),     # W0' (full)
                pl.BlockSpec((h1, h0), lambda i: (0, 0)),       # W1' (full)
                pl.BlockSpec((d_out, h1), lambda i: (0, 0)),    # W2' (full)
            ],
            out_specs=pl.BlockSpec((d_out, tile), lambda i: (0, i)),
        ),
        compiler_params=pltpu.CompilerParams(
            dimension_semantics=("parallel",)),
        cost_estimate=cost,
    )(xp, w0t, w1t, w2t)

    yt = yt[:, :n]
    if lane_dense_output:
        return yt       # (d_out, n): consumer absorbs the transpose (cheapest)
    return yt.T         # (n, d_out): the module's native layout


# ----------------------------------------------------------------------------
# Public API: pre-scale / pre-transpose the e3nn weights ONCE and return a
# jitted forward(x) closure (weight prep hoisted out of the per-call path).
# ----------------------------------------------------------------------------
def make_fcn_e3nn_forward(w0, w1, w2, *, tile_n=512, lane_dense_output=False,
                          mxu_dtype=jnp.float32):
    d_in, h0 = w0.shape
    h1 = w1.shape[1]
    s0 = 1.0 / np.sqrt(float(d_in))
    s1 = 1.0 / np.sqrt(float(h0))
    s2 = 1.0 / np.sqrt(float(h1))
    # 1/sqrt(fan_in) of each layer plus the normalize2mom const of layer l
    # fold into layer l+1's weights (matmul is linear).
    w0t = (w0.astype(jnp.float32) * jnp.float32(s0)).T.astype(mxu_dtype)
    w1t = (w1.astype(jnp.float32) * jnp.float32(s1 * ACT_CST)).T.astype(mxu_dtype)
    w2t = (w2.astype(jnp.float32) * jnp.float32(s2 * ACT_CST)).T.astype(mxu_dtype)

    @jax.jit
    def forward(x):
        return _fcn_forward(x, w0t, w1t, w2t, tile_n=tile_n,
                            lane_dense_output=lane_dense_output)

    return forward


def fcn_e3nn_forward(x, w0, w1, w2, *, tile_n=512):
    """One-shot convenience wrapper (prefer make_fcn_e3nn_forward in a model)."""
    return make_fcn_e3nn_forward(w0, w1, w2, tile_n=tile_n)(x)


# ----------------------------------------------------------------------------
# Pure-JAX reference (original, untransposed math) for a correctness check.
# ----------------------------------------------------------------------------
def fcn_e3nn_reference(x, w0, w1, w2):
    d_in, h0, h1 = w0.shape[0], w1.shape[0], w2.shape[0]
    h = x.astype(jnp.float32)
    h = h @ (w0 / jnp.sqrt(float(d_in)))
    h = ACT_CST * jax.nn.silu(h)
    h = h @ (w1 / jnp.sqrt(float(h0)))
    h = ACT_CST * jax.nn.silu(h)
    y = h @ (w2 / jnp.sqrt(float(h1)))
    return y.astype(x.dtype)


if __name__ == "__main__":
    # Module config (synthetic): irreps_in = "16x0e" (scalars only) -> inp_dim=16,
    # hidden_neurons=[32, 32], dim_out=8, activation=SiLU.
    # N_NODES deliberately NOT a multiple of 128 to exercise tail padding.
    N_NODES, D_IN, H0, H1, D_OUT = 300, 16, 32, 32, 8

    key = jax.random.PRNGKey(0)
    k_x, k0, k1, k2 = jax.random.split(key, 4)

    # data[key_input]: scalar node features, layout [N_nodes, D_features]
    x = jax.random.normal(k_x, (N_NODES, D_IN), dtype=jnp.float32)
    # e3nn FullyConnectedNet weights ~ N(0,1) (scaling applied in forward)
    w0 = jax.random.normal(k0, (D_IN, H0), dtype=jnp.float32)
    w1 = jax.random.normal(k1, (H0, H1), dtype=jnp.float32)
    w2 = jax.random.normal(k2, (H1, D_OUT), dtype=jnp.float32)

    fwd = make_fcn_e3nn_forward(w0, w1, w2)
    out = jax.block_until_ready(fwd(x))

    ref = fcn_e3nn_reference(x, w0, w1, w2)
    np.testing.assert_allclose(np.asarray(out), np.asarray(ref),
                               rtol=5e-5, atol=5e-5)

    # The module writes the result back into the data dict under key_output.
    data = {"node_scalars": x}
    data["fcn_out"] = out

    print("KERNEL_OK")
</pallas_src>

<mosaic_0001>
module attributes {stable_mosaic.version = 11 : i64} {
  func.func @_fcn_kernel(%arg0: i32, %arg1: memref<256x16xf32, #tpu.memory_space<vmem>>, %arg2: memref<32x16xf32, #tpu.memory_space<vmem>>, %arg3: memref<32x32xf32, #tpu.memory_space<vmem>>, %arg4: memref<8x32xf32, #tpu.memory_space<vmem>>, %arg5: memref<8x256xf32, #tpu.memory_space<vmem>>) attributes {dimension_semantics = [#tpu.dimension_semantics<parallel>], iteration_bounds = array<i64: 2>, scalar_prefetch = 0 : i64, scratch_operands = 0 : i64, tpu.core_type = #tpu.core_type<tc>, window_params = [{transform_indices = @transform_0, window_bounds = array<i64: 256, 16>}, {pipeline_mode = #tpu.pipeline_mode<synchronous>, transform_indices = @transform_1, window_bounds = array<i64: 32, 16>}, {pipeline_mode = #tpu.pipeline_mode<synchronous>, transform_indices = @transform_2, window_bounds = array<i64: 32, 32>}, {pipeline_mode = #tpu.pipeline_mode<synchronous>, transform_indices = @transform_3, window_bounds = array<i64: 8, 32>}, {transform_indices = @transform_4, window_bounds = array<i64: 8, 256>}]} {
    %c0 = arith.constant 0 : index
    %c0_0 = arith.constant 0 : index
    %0 = vector.load %arg2[%c0, %c0_0] : memref<32x16xf32, #tpu.memory_space<vmem>>, vector<32x16xf32>
    %c0_1 = arith.constant 0 : index
    %c0_2 = arith.constant 0 : index
    %1 = vector.load %arg1[%c0_1, %c0_2] : memref<256x16xf32, #tpu.memory_space<vmem>>, vector<256x16xf32>
    %cst = arith.constant dense<0.000000e+00> : vector<32x256xf32>
    %2 = tpu.matmul %0, %1, %cst {dimension_numbers = #tpu.dot_dimension_numbers<[1], [1], [0], [0], [0, 0, 1, 0], [], []>} : vector<32x16xf32>, vector<256x16xf32>, vector<32x256xf32> -> vector<32x256xf32>
    %cst_3 = arith.constant 5.000000e-01 : f32
    %3 = vector.broadcast %cst_3 : f32 to vector<32x256xf32>
    %4 = arith.mulf %3, %2 : vector<32x256xf32>
    %5 = math.tanh %4 : vector<32x256xf32>
    %cst_4 = arith.constant 1.000000e+00 : f32
    %6 = vector.broadcast %cst_4 : f32 to vector<32x256xf32>
    %7 = arith.addf %5, %6 : vector<32x256xf32>
    %cst_5 = arith.constant 5.000000e-01 : f32
    %8 = vector.broadcast %cst_5 : f32 to vector<32x256xf32>
    %9 = arith.mulf %8, %7 : vector<32x256xf32>
    %10 = arith.mulf %2, %9 : vector<32x256xf32>
    %c0_6 = arith.constant 0 : index
    %c0_7 = arith.constant 0 : index
    %11 = vector.load %arg3[%c0_6, %c0_7] : memref<32x32xf32, #tpu.memory_space<vmem>>, vector<32x32xf32>
    %cst_8 = arith.constant dense<0.000000e+00> : vector<32x256xf32>
    %12 = tpu.matmul %11, %10, %cst_8 {dimension_numbers = #tpu.dot_dimension_numbers<[1], [0], [0], [1], [0, 0, 1, 1], [], []>} : vector<32x32xf32>, vector<32x256xf32>, vector<32x256xf32> -> vector<32x256xf32>
    %cst_9 = arith.constant 5.000000e-01 : f32
    %13 = vector.broadcast %cst_9 : f32 to vector<32x256xf32>
    %14 = arith.mulf %13, %12 : vector<32x256xf32>
    %15 = math.tanh %14 : vector<32x256xf32>
    %cst_10 = arith.constant 1.000000e+00 : f32
    %16 = vector.broadcast %cst_10 : f32 to vector<32x256xf32>
    %17 = arith.addf %15, %16 : vector<32x256xf32>
    %cst_11 = arith.constant 5.000000e-01 : f32
    %18 = vector.broadcast %cst_11 : f32 to vector<32x256xf32>
    %19 = arith.mulf %18, %17 : vector<32x256xf32>
    %20 = arith.mulf %12, %19 : vector<32x256xf32>
    %c0_12 = arith.constant 0 : index
    %c0_13 = arith.constant 0 : index
    %21 = vector.load %arg4[%c0_12, %c0_13] : memref<8x32xf32, #tpu.memory_space<vmem>>, vector<8x32xf32>
    %cst_14 = arith.constant dense<0.000000e+00> : vector<8x256xf32>
    %22 = tpu.matmul %21, %20, %cst_14 {dimension_numbers = #tpu.dot_dimension_numbers<[1], [0], [0], [1], [0, 0, 1, 1], [], []>} : vector<8x32xf32>, vector<32x256xf32>, vector<8x256xf32> -> vector<8x256xf32>
    %c0_15 = arith.constant 0 : index
    %c0_16 = arith.constant 0 : index
    %23 = vector.load %arg5[%c0_15, %c0_16] : memref<8x256xf32, #tpu.memory_space<vmem>>, vector<8x256xf32>
    tpu.vector_store %arg5[%c0_15, %c0_16], %22 {strides = array<i32>} : memref<8x256xf32, #tpu.memory_space<vmem>>, vector<8x256xf32>,
    return
  }
  func.func @transform_0(%arg0: i32) -> (i32, i32) {
    %c0_i32 = arith.constant 0 : i32
    %c0_i32_0 = arith.constant 0 : i32
    return %arg0, %c0_i32 : i32, i32
  }
  func.func @transform_1(%arg0: i32) -> (i32, i32) {
    %c0_i32 = arith.constant 0 : i32
    %c0_i32_0 = arith.constant 0 : i32
    %c0_i32_1 = arith.constant 0 : i32
    return %c0_i32, %c0_i32_0 : i32, i32
  }
  func.func @transform_2(%arg0: i32) -> (i32, i32) {
    %c0_i32 = arith.constant 0 : i32
    %c0_i32_0 = arith.constant 0 : i32
    %c0_i32_1 = arith.constant 0 : i32
    return %c0_i32, %c0_i32_0 : i32, i32
  }
  func.func @transform_3(%arg0: i32) -> (i32, i32) {
    %c0_i32 = arith.constant 0 : i32
    %c0_i32_0 = arith.constant 0 : i32
    %c0_i32_1 = arith.constant 0 : i32
    return %c0_i32, %c0_i32_0 : i32, i32
  }
  func.func @transform_4(%arg0: i32) -> (i32, i32) {
    %c0_i32 = arith.constant 0 : i32
    %c0_i32_0 = arith.constant 0 : i32
    return %c0_i32, %arg0 : i32, i32
  }
}

</mosaic_0001>

<bundles_post_ra>
// kernel: forward.1
= control target key start
LH: loop header
LB: loop body
LE: loop exit
PB: predicated region body
PF: predicated region fallthrough
CT: control target
= control target key end

     0   :  { %s921_s15 = smov 0   ;;  %s1057_s0 = inlined_call_operand.vmem [shape: f32[512,16], index: 0, kind: input, shape index: {}]   ;;  %s1058_s1 = inlined_call_operand.vmem [shape: f32[32,16], index: 1, kind: input, shape index: {}]   ;;  %s1059_s2 = inlined_call_operand.vmem [shape: f32[32,32], index: 2, kind: input, shape index: {}]   ;;  %s1060_s3 = inlined_call_operand.vmem [shape: f32[8,32], index: 3, kind: input, shape index: {}]   ;;  %s1061_s4 = inlined_call_operand.vmem [shape: f32[8,512], index: 4, kind: output, shape index: {}]  }
   0x1 LB: > { %s754_s16 = sadd.s32 4294967295, %s893_s15   ;;  %p758_p0 = scmp.ge.s32.totalorder %s893_s15, 1  ;;  %s893_s15 = sphi %s921_s15, %s14_s15  }
   0x2   : > { %p163_p1 = scmp.lt.s32.totalorder %s893_s15, 3 }
   0x4   : > { %p164_p2 = pnand %p758_p0, %p163_p1 }
   0x5   : > { %s759_s17 = sshll.u32 (!%p164_p2), %s754_s16, 5  ;;  %s761_s14 = sshll.u32 (!%p164_p2), %s754_s16, 1 }
   0x6   : > { %167 = sbr.rel (%p164_p2) target bundleno = 749 (0x2ed), region = 36  ;;  %p190_p3 = scmp.lt.s32.totalorder (!%p164_p2), %s759_s17, 63 }
   0x7   : > { %p196_p4 = scmp.lt.s32.totalorder (!%p164_p2), %s761_s14, 3 }
   0xb   : > { %vm237_vm0 = vcmask 130048   ;;  %v934_v0 = vld [vmem:[%s1058_s1] sm:$0xff]  ;;  %s1063_s17 = smov (!%p190_p3, %s759_s17), 63  ;;  %v202_v33 = vld [vmem:[%s1058_s1 + $0x8] sm:$0xff]  ;;  %v203_v34 = vld [vmem:[%s1058_s1 + $0x10] sm:$0xff]  ;;  %v895_v36 = vmov 0.0  }
   0xc   : > { %838 = vmatprep.mubr.msk.f32.mxu0 %vm237_vm0, %v934_v0  ;;  %s760_s20 = sshll.u32 %s1063_s17, 3  ;;  %v204_v35 = vld [vmem:[%s1058_s1 + $0x18] sm:$0xff]  ;;  %556 = vmatprep.mubr.f32.mxu1 %v895_v36  ;;  %vm479_vm1 = vcmask 261120   ;;  %s1065_s14 = smov (!%p196_p4, %s761_s14), 3 }
   0xd   : > { %s941_s23 = scalar_lea.vmem %s1057_s0, %s760_s20  ;;  %s762_s17 = sshll.u32 %s1065_s14, 3 }
   0xe   : > { %v236_v1 = vld [vmem:[%s941_s23 + $0xf8] sm:$0xff]  ;;  %v235_v3 = vld [vmem:[%s941_s23 + $0xf0] sm:$0xff]  ;;  %v234_v5 = vld [vmem:[%s941_s23 + $0xe8] sm:$0xff]  ;;  %s199_s20 = scalar_lea.vmem %s1061_s4, %s762_s17 }
   0xf   : > { %v220_v2 = vld [vmem:[%s941_s23 + $0x78] sm:$0xff]  ;;  %806 = vmatprep.subr.msk.mxu0 %vm237_vm0, %v236_v1  ;;  %v219_v4 = vld [vmem:[%s941_s23 + $0x70] sm:$0xff]  ;;  %v218_v6 = vld [vmem:[%s941_s23 + $0x68] sm:$0xff] }
  0x10   : > { %807 = vmatpush3.xpose.msk.msra.mxu0 %vm237_vm0, %v220_v2  ;;  %v233_v7 = vld [vmem:[%s941_s23 + $0xe0] sm:$0xff]  ;;  %v232_v9 = vld [vmem:[%s941_s23 + $0xd8] sm:$0xff]  ;;  %v231_v11 = vld [vmem:[%s941_s23 + $0xd0] sm:$0xff] }
  0x11   : > { %808 = vmatprep.subr.msk.mxu0 %vm237_vm0, %v235_v3  ;;  %v217_v8 = vld [vmem:[%s941_s23 + $0x60] sm:$0xff]  ;;  %v216_v10 = vld [vmem:[%s941_s23 + $0x58] sm:$0xff]  ;;  %v215_v12 = vld [vmem:[%s941_s23 + $0x50] sm:$0xff] }
  0x12   : > { %v230_v13 = vld [vmem:[%s941_s23 + $0xc8] sm:$0xff]  ;;  %v229_v15 = vld [vmem:[%s941_s23 + $0xc0] sm:$0xff]  ;;  %v228_v17 = vld [vmem:[%s941_s23 + $0xb8] sm:$0xff] }
  0x13   : > { %v214_v14 = vld [vmem:[%s941_s23 + $0x48] sm:$0xff]  ;;  %v213_v16 = vld [vmem:[%s941_s23 + $0x40] sm:$0xff]  ;;  %v212_v18 = vld [vmem:[%s941_s23 + $0x38] sm:$0xff] }
  0x14   : > { %809 = vmatpush3.xpose.msk.msra.mxu0 %vm237_vm0, %v219_v4  ;;  %v227_v19 = vld [vmem:[%s941_s23 + $0xb0] sm:$0xff]  ;;  %v226_v21 = vld [vmem:[%s941_s23 + $0xa8] sm:$0xff]  ;;  %v225_v23 = vld [vmem:[%s941_s23 + $0xa0] sm:$0xff] }
  0x15   : > { %810 = vmatprep.subr.msk.mxu0 %vm237_vm0, %v234_v5  ;;  %v211_v20 = vld [vmem:[%s941_s23 + $0x30] sm:$0xff]  ;;  %v210_v22 = vld [vmem:[%s941_s23 + $0x28] sm:$0xff]  ;;  %v209_v24 = vld [vmem:[%s941_s23 + $0x20] sm:$0xff] }
  0x16   : > { %v224_v25 = vld [vmem:[%s941_s23 + $0x98] sm:$0xff]  ;;  %v223_v27 = vld [vmem:[%s941_s23 + $0x90] sm:$0xff]  ;;  %v222_v29 = vld [vmem:[%s941_s23 + $0x88] sm:$0xff] }
  0x17   : > { %v208_v26 = vld [vmem:[%s941_s23 + $0x18] sm:$0xff]  ;;  %v207_v28 = vld [vmem:[%s941_s23 + $0x10] sm:$0xff]  ;;  %v206_v30 = vld [vmem:[%s941_s23 + $0x8] sm:$0xff] }
  0x18   : > { %811 = vmatpush3.xpose.msk.msra.mxu0 %vm237_vm0, %v218_v6  ;;  %v221_v31 = vld [vmem:[%s941_s23 + $0x80] sm:$0xff] }
  0x19   : > { %812 = vmatprep.subr.msk.mxu0 %vm237_vm0, %v233_v7  ;;  %v205_v32 = vld [vmem:[%s941_s23] sm:$0xff] }
  0x1c   : > { %813 = vmatpush3.xpose.msk.msra.mxu0 %vm237_vm0, %v217_v8 }
  0x1d   : > { %814 = vmatprep.subr.msk.mxu0 %vm237_vm0, %v232_v9 }
  0x20   : > { %815 = vmatpush3.xpose.msk.msra.mxu0 %vm237_vm0, %v216_v10 }
  0x21   : > { %816 = vmatprep.subr.msk.mxu0 %vm237_vm0, %v231_v11 }
  0x24   : > { %817 = vmatpush3.xpose.msk.msra.mxu0 %vm237_vm0, %v215_v12 }
  0x25   : > { %818 = vmatprep.subr.msk.mxu0 %vm237_vm0, %v230_v13 }
  0x28   : > { %819 = vmatpush3.xpose.msk.msra.mxu0 %vm237_vm0, %v214_v14 }
  0x29   : > { %820 = vmatprep.subr.msk.mxu0 %vm237_vm0, %v229_v15 }
  0x2c   : > { %821 = vmatpush3.xpose.msk.msra.mxu0 %vm237_vm0, %v213_v16 }
  0x2d   : > { %822 = vmatprep.subr.msk.mxu0 %vm237_vm0, %v228_v17 }
  0x30   : > { %823 = vmatpush3.xpose.msk.msra.mxu0 %vm237_vm0, %v212_v18 }
  0x31   : > { %824 = vmatprep.subr.msk.mxu0 %vm237_vm0, %v227_v19 }
  0x34   : > { %825 = vmatpush3.xpose.msk.msra.mxu0 %vm237_vm0, %v211_v20 }
  0x35   : > { %826 = vmatprep.subr.msk.mxu0 %vm237_vm0, %v226_v21  ;;  %v475_v21 = vld [vmem:[%s1059_s2] sm:$0xff] }
  0x38   : > { %827 = vmatpush3.xpose.msk.msra.mxu0 %vm237_vm0, %v210_v22  ;;  %v476_v22 = vld [vmem:[%s1059_s2 + $0x8] sm:$0xff] }
  0x39   : > { %828 = vmatprep.subr.msk.mxu0 %vm237_vm0, %v225_v23  ;;  %v477_v23 = vld [vmem:[%s1059_s2 + $0x10] sm:$0xff] }
  0x3c   : > { %829 = vmatpush3.xpose.msk.msra.mxu0 %vm237_vm0, %v209_v24  ;;  %v478_v24 = vld [vmem:[%s1059_s2 + $0x18] sm:$0xff] }
  0x3d   : > { %830 = vmatprep.subr.msk.mxu0 %vm237_vm0, %v224_v25 }
  0x40   : > { %831 = vmatpush3.xpose.msk.msra.mxu0 %vm237_vm0, %v208_v26 }
  0x41   : > { %832 = vmatprep.subr.msk.mxu0 %vm237_vm0, %v223_v27 }
  0x44   : > { %833 = vmatpush3.xpose.msk.msra.mxu0 %vm237_vm0, %v207_v28 }
  0x45   : > { %834 = vmatprep.subr.msk.mxu0 %vm237_vm0, %v222_v29 }
  0x48   : > { %835 = vmatpush3.xpose.msk.msra.mxu0 %vm237_vm0, %v206_v30 }
  0x49   : > { %836 = vmatprep.subr.msk.mxu0 %vm237_vm0, %v221_v31 }
  0x4c   : > { %837 = vmatpush3.xpose.msk.msra.mxu0 %vm237_vm0, %v205_v32 }
  0x4f   : > { %839 = vmatmul.mubr.msk.f32.vlgmr.msra.gmra.mxu0 %vm237_vm0, %v934_v0 }
  0x50   : > { %840 = vmatprep.mubr.msk.f32.mxu0 %vm237_vm0, %v202_v33 }
  0x53   : > { %841 = vmatmul.mubr.msk.f32.gmra.mxu0 %vm237_vm0, %v202_v33 }
  0x54   : > { %842 = vmatprep.mubr.msk.f32.mxu0 %vm237_vm0, %v203_v34 }
  0x57   : > { %843 = vmatmul.mubr.msk.f32.gmra.mxu0 %vm237_vm0, %v203_v34 }
  0x58   : > { %844 = vmatprep.mubr.msk.f32.mxu0 %vm237_vm0, %v204_v35 }
  0x5b   : > { %845 = vmatmul.mubr.msk.f32.gmra.mxu0 %vm237_vm0, %v204_v35 }
 0x10f   : > { %v412_v37 = vpop.f32.mrf.mxu0 }
 0x110   : > { %v435_v50 = vmul.f32 0.5, %v412_v37 }
 0x111   : > { %v414_v38 = vpop.f32.mrf.mxu0 }
 0x112   : > { %v436_v41 = vmul.f32 0.5, %v414_v38 }
 0x113   : > { %v418_v39 = vpop.f32.mrf.mxu0 }
 0x114   : > { %855 = vtanh.f32 %v436_v41  ;;  %v437_v47 = vmul.f32 0.5, %v418_v39 }
 0x115   : > { %v420_v40 = vpop.f32.mrf.mxu0 }
 0x116   : > { %v438_v42 = vmul.f32 0.5, %v420_v40 }
 0x117   : > { %v424_v43 = vpop.f32.mrf.mxu0 }
 0x118   : > { %v439_v44 = vmul.f32 0.5, %v424_v43  ;;  %857 = vtanh.f32 %v438_v42 }
 0x119   : > { %v426_v45 = vpop.f32.mrf.mxu0 }
 0x11a   : > { %v440_v46 = vmul.f32 0.5, %v426_v45 }
 0x11b   : > { %v430_v48 = vpop.f32.mrf.mxu0 }
 0x11c   : > { %859 = vtanh.f32 %v440_v46  ;;  %v441_v49 = vmul.f32 0.5, %v430_v48 }
 0x11d   : > { %861 = vtanh.f32 %v439_v44  ;;  %v432_v51 = vpop.f32.mrf.mxu0 }
 0x11e   : > { %863 = vtanh.f32 %v441_v49  ;;  %v442_v52 = vmul.f32 0.5, %v432_v51 }
 0x11f   : > { %865 = vtanh.f32 %v437_v47 }
 0x120   : > { %867 = vtanh.f32 %v442_v52 }
 0x121   : > { %869 = vtanh.f32 %v435_v50  ;;  %v856_v53 = vpop.eup %855 }
 0x122   : > { %v452_v4 = vadd.f32 1.0, %v856_v53 }
 0x124   : > { %v460_v13 = vmul.f32 0.5, %v452_v4 }
 0x125   : > { %v858_v54 = vpop.eup %857 }
 0x126   : > { %v454_v0 = vadd.f32 1.0, %v858_v54  ;;  %v468_v19 = vmul.f32 %v460_v13, %v414_v38 }
 0x128   : > { %v462_v9 = vmul.f32 0.5, %v454_v0 }
 0x129   : > { %v860_v55 = vpop.eup %859 }
 0x12a   : > { %v862_v56 = vpop.eup %861  ;;  %v456_v59 = vadd.f32 1.0, %v860_v55  ;;  %v470_v17 = vmul.f32 %v462_v9, %v420_v40  ;;  %v621_v9 = vld [vmem:[%s1060_s3] sm:$0xff] }
 0x12b   : > { %v864_v57 = vpop.eup %863  ;;  %v455_v62 = vadd.f32 1.0, %v862_v56 }
 0x12c   : > { %v866_v58 = vpop.eup %865  ;;  %v457_v60 = vadd.f32 1.0, %v864_v57  ;;  %v464_v5 = vmul.f32 0.5, %v456_v59 }
 0x12d   : > { %v868_v61 = vpop.eup %867  ;;  %v453_v2 = vadd.f32 1.0, %v866_v58  ;;  %v463_v8 = vmul.f32 0.5, %v455_v62 }
 0x12e   : > { %v870_v63 = vpop.eup %869  ;;  %v458_v1 = vadd.f32 1.0, %v868_v61  ;;  %v465_v3 = vmul.f32 0.5, %v457_v60  ;;  %v472_v14 = vmul.f32 %v464_v5, %v426_v45 }
 0x12f   : > { %v451_v7 = vadd.f32 1.0, %v870_v63  ;;  %v461_v11 = vmul.f32 0.5, %v453_v2  ;;  %v471_v16 = vmul.f32 %v463_v8, %v424_v43 }
 0x130   : > { %v466_v6 = vmul.f32 0.5, %v458_v1  ;;  %v473_v12 = vmul.f32 %v465_v3, %v430_v48 }
 0x131   : > { %v459_v15 = vmul.f32 0.5, %v451_v7  ;;  %v469_v18 = vmul.f32 %v461_v11, %v418_v39 }
 0x132   : > { %v474_v10 = vmul.f32 %v466_v6, %v432_v51 }
 0x133   : > { %v467_v20 = vmul.f32 %v459_v15, %v412_v37 }
 0x134   : > { %516 = vmatprep.subr.mxu1 %v474_v10 }
 0x135   : > { %517 = vmatpush1.msra.mxu1 %v473_v12 }
 0x136   : > { %518 = vmatprep.subr.mxu1 %v472_v14 }
 0x137   : > { %519 = vmatpush1.msra.mxu1 %v471_v16 }
 0x138   : > { %520 = vmatprep.subr.mxu1 %v470_v17 }
 0x139   : > { %521 = vmatpush1.msra.mxu1 %v469_v18 }
 0x13a   : > { %522 = vmatprep.subr.mxu1 %v468_v19 }
 0x13b   : > { %523 = vmatpush1.msra.mxu1 %v467_v20 }
 0x13c   : > { %799 = vmatmul.mubr.msk.f32.vlgmr.msra.gmra.mxu1 %vm479_vm1, %v475_v21 }
 0x13d   : > { %562 = vmatprep.mubr.f32.mxu1 %v895_v36 }
 0x140   : > { %800 = vmatmul.mubr.msk.f32.gmra.mxu1 %vm479_vm1, %v476_v22 }
 0x141   : > { %568 = vmatprep.mubr.f32.mxu1 %v895_v36 }
 0x144   : > { %801 = vmatmul.mubr.msk.f32.gmra.mxu1 %vm479_vm1, %v477_v23 }
 0x145   : > { %574 = vmatprep.mubr.f32.mxu1 %v895_v36 }
 0x148   : > { %802 = vmatmul.mubr.msk.f32.gmra.mxu1 %vm479_vm1, %v478_v24 }
 0x149   : > { %689 = vmatprep.mubr.f32.mxu1 %v895_v36 }
 0x1fc   : > { %v558_v25 = vpop.f32.mrf.mxu1 }
 0x1fd   : > { %v581_v39 = vmul.f32 0.5, %v558_v25 }
 0x1fe   : > { %v560_v26 = vpop.f32.mrf.mxu1 }
 0x1ff   : > { %v582_v29 = vmul.f32 0.5, %v560_v26 }
 0x200   : > { %v564_v27 = vpop.f32.mrf.mxu1 }
 0x201   : > { %871 = vtanh.f32 %v582_v29  ;;  %v583_v35 = vmul.f32 0.5, %v564_v27 }
 0x202   : > { %v566_v28 = vpop.f32.mrf.mxu1 }
 0x203   : > { %v584_v30 = vmul.f32 0.5, %v566_v28 }
 0x204   : > { %v570_v31 = vpop.f32.mrf.mxu1 }
 0x205   : > { %v585_v32 = vmul.f32 0.5, %v570_v31  ;;  %873 = vtanh.f32 %v584_v30 }
 0x206   : > { %v572_v33 = vpop.f32.mrf.mxu1 }
 0x207   : > { %v586_v34 = vmul.f32 0.5, %v572_v33 }
 0x208   : > { %v576_v37 = vpop.f32.mrf.mxu1 }
 0x209   : > { %875 = vtanh.f32 %v586_v34  ;;  %v587_v38 = vmul.f32 0.5, %v576_v37 }
 0x20a   : > { %877 = vtanh.f32 %v585_v32  ;;  %v578_v40 = vpop.f32.mrf.mxu1 }
 0x20b   : > { %879 = vtanh.f32 %v587_v38  ;;  %v588_v36 = vmul.f32 0.5, %v578_v40 }
 0x20c   : > { %881 = vtanh.f32 %v583_v35 }
 0x20d   : > { %883 = vtanh.f32 %v588_v36 }
 0x20e   : > { %885 = vtanh.f32 %v581_v39  ;;  %v872_v41 = vpop.eup %871 }
 0x20f   : > { %v598_v56 = vadd.f32 1.0, %v872_v41 }
 0x211   : > { %v606_v1 = vmul.f32 0.5, %v598_v56 }
 0x212   : > { %v874_v42 = vpop.eup %873 }
 0x213   : > { %v600_v52 = vadd.f32 1.0, %v874_v42  ;;  %v614_v7 = vmul.f32 %v606_v1, %v560_v26 }
 0x215   : > { %v608_v61 = vmul.f32 0.5, %v600_v52 }
 0x216   : > { %v876_v43 = vpop.eup %875 }
 0x217   : > { %v878_v44 = vpop.eup %877  ;;  %v602_v47 = vadd.f32 1.0, %v876_v43  ;;  %v616_v5 = vmul.f32 %v608_v61, %v566_v28 }
 0x218   : > { %v880_v45 = vpop.eup %879  ;;  %v601_v50 = vadd.f32 1.0, %v878_v44 }
 0x219   : > { %v882_v46 = vpop.eup %881  ;;  %v603_v48 = vadd.f32 1.0, %v880_v45  ;;  %v610_v57 = vmul.f32 0.5, %v602_v47 }
 0x21a   : > { %v884_v49 = vpop.eup %883  ;;  %v599_v54 = vadd.f32 1.0, %v882_v46  ;;  %v609_v60 = vmul.f32 0.5, %v601_v50 }
 0x21b   : > { %v886_v51 = vpop.eup %885  ;;  %v604_v53 = vadd.f32 1.0, %v884_v49  ;;  %v611_v55 = vmul.f32 0.5, %v603_v48  ;;  %v618_v2 = vmul.f32 %v610_v57, %v572_v33 }
 0x21c   : > { %v597_v59 = vadd.f32 1.0, %v886_v51  ;;  %v607_v63 = vmul.f32 0.5, %v599_v54  ;;  %v617_v4 = vmul.f32 %v609_v60, %v570_v31 }
 0x21d   : > { %v612_v58 = vmul.f32 0.5, %v604_v53  ;;  %v619_v0 = vmul.f32 %v611_v55, %v576_v37 }
 0x21e   : > { %v605_v3 = vmul.f32 0.5, %v597_v59  ;;  %v615_v6 = vmul.f32 %v607_v63, %v564_v27 }
 0x21f   : > { %v620_v62 = vmul.f32 %v612_v58, %v578_v40 }
 0x220   : > { %v613_v8 = vmul.f32 %v605_v3, %v558_v25 }
 0x221   : > { %649 = vmatprep.subr.mxu1 %v620_v62 }
 0x222   : > { %650 = vmatpush1.msra.mxu1 %v619_v0 }
 0x223   : > { %651 = vmatprep.subr.mxu1 %v618_v2 }
 0x224   : > { %652 = vmatpush1.msra.mxu1 %v617_v4 }
 0x225   : > { %653 = vmatprep.subr.mxu1 %v616_v5 }
 0x226   : > { %654 = vmatpush1.msra.mxu1 %v615_v6 }
 0x227   : > { %655 = vmatprep.subr.mxu1 %v614_v7 }
 0x228   : > { %656 = vmatpush1.msra.mxu1 %v613_v8 }
 0x229   : > { %803 = vmatmul.mubr.msk.f32.vlgmr.msra.gmra.mxu1 %vm479_vm1, %v621_v9 }
 0x2e9   : > { %v691_v10 = vpop.f32.mrf.mxu1 }
 0x2ea   : > { %696 = vst [vmem:[%s199_s20] sm:$0xff] %v691_v10 }
 0x2eb   : > { %v693_v11 = vpop.f32.mrf.mxu1 }
 0x2ec   : > { %697 = vst [vmem:[%s199_s20 + $0x8] sm:$0xff] %v693_v11 }
 0x2ed PF: > { %s14_s15 = sadd.s32 1, %s893_s15  }
 0x2ee   : > { %p11_p5 = scmp.ge.s32.totalorder %s14_s15, 4  }
 0x2f0   :  { %13 = sbr.rel (!%p11_p5) target bundleno = 1 (0x1), region = 66 }

</bundles_post_ra>
